<compile_context>
chip_gen: v7x
topology: tpu7x:2x2x1
jax: 0.10.0
libtpu: 0.0.40
codegen_flags: <defaults>
</compile_context>

<pallas_src>
import math

import jax
import jax.numpy as jnp
from jax import lax
from jax.experimental import pallas as pl
from jax.experimental.pallas import tpu as pltpu


def _round_up(x: int, m: int) -> int:
    return (x + m - 1) // m * m


def _make_kernel(prior_std: float, in_features: int, out_features: int,
                 tile_i: int, tile_o: int, mask_rows: bool, mask_cols: bool):
    log_prior = math.log(prior_std)
    inv_2var = 1.0 / (2.0 * prior_std * prior_std)

    def _softplus(rho):
        # Numerically stable softplus (matches F.softplus threshold behaviour).
        return jnp.where(rho > 20.0, rho,
                         jnp.log1p(jnp.exp(jnp.minimum(rho, 20.0))))

    def _kl_terms(mu, sigma):
        # KL( N(mu, sigma) || N(0, prior_std) ) per element.
        return (log_prior - jnp.log(sigma)
                + (sigma * sigma + mu * mu) * inv_2var - 0.5)

    def kernel(x_ref, wmu_ref, wrho_ref, bmu_ref, brho_ref, epsw_ref, epsb_ref,
               out_ref, kl_ref, acc_ref, kl_sm):
        j = pl.program_id(0)          # out_features tile (parallel)
        k = pl.program_id(1)          # in_features tile (reduction)
        nk = pl.num_programs(1)

        @pl.when(k == 0)
        def _():
            acc_ref[...] = jnp.zeros_like(acc_ref)
            kl_sm[0, 0] = jnp.float32(0.0)

        wmu = wmu_ref[...]                              # [tile_i, tile_o]
        wsig = _softplus(wrho_ref[...])
        w = wmu + wsig * epsw_ref[...]                  # sampled weight tile

        # MXU: x[B, tile_i] @ w[tile_i, tile_o]  (lane-dense output).
        acc_ref[...] += jnp.dot(x_ref[...], w, preferred_element_type=jnp.float32)

        # Per-tile weight-KL partial, masked against zero-padding, accumulated in SMEM.
        kl_w = _kl_terms(wmu, wsig)
        if mask_rows or mask_cols:
            row = k * tile_i + lax.broadcasted_iota(jnp.int32, (tile_i, tile_o), 0)
            col = j * tile_o + lax.broadcasted_iota(jnp.int32, (tile_i, tile_o), 1)
            kl_w = jnp.where((row < in_features) & (col < out_features), kl_w, 0.0)
        kl_sm[0, 0] += jnp.sum(kl_w)

        @pl.when(k == nk - 1)
        def _():
            # Bias reparameterization + bias KL only once per output tile.
            bmu = bmu_ref[...]                          # [1, tile_o]
            bsig = _softplus(brho_ref[...])
            b = bmu + bsig * epsb_ref[...]
            out_ref[...] = (acc_ref[...] + b).astype(out_ref.dtype)

            kl_b = _kl_terms(bmu, bsig)
            if mask_cols:
                col = j * tile_o + lax.broadcasted_iota(jnp.int32, (1, tile_o), 1)
                kl_b = jnp.where(col < out_features, kl_b, 0.0)
            kl_ref[0, 0] = kl_sm[0, 0] + jnp.sum(kl_b)

    return kernel


def bayesian_linear(x, weight_mu, weight_rho, bias_mu, bias_rho, eps_w, eps_b,
                    prior_std: float = 1.0, *, tile_i: int = 256, tile_o: int = 512):
    """Forward of BayesianLinear.

    x: [batch, in_features]; weight params: [out_features, in_features] (PyTorch
    nn.Linear convention); bias params: [out_features]. eps_w / eps_b are
    standard-normal noise generated outside the kernel (deterministic/testable).
    Returns (out [batch, out_features], kl scalar).
    """
    batch, in_features = x.shape
    out_features = weight_mu.shape[0]
    assert weight_mu.shape == (out_features, in_features)

    # [O, I] -> [I, O] so the MXU RHS is not contracted on its last dim.
    wmu_t = weight_mu.T
    wrho_t = weight_rho.T
    epsw_t = eps_w.T

    bmu2 = bias_mu.reshape(1, out_features)
    brho2 = bias_rho.reshape(1, out_features)
    epsb2 = eps_b.reshape(1, out_features)

    # Tile / padding choices: (8, 128)-aligned, tiles sized for default scoped VMEM.
    tile_i = min(tile_i, _round_up(in_features, 128))
    tile_o = min(tile_o, _round_up(out_features, 128))
    b_pad = _round_up(batch, 8)
    i_pad = _round_up(in_features, tile_i)
    o_pad = _round_up(out_features, tile_o)

    def pad2(a, rows, cols):
        return jnp.pad(a, ((0, rows - a.shape[0]), (0, cols - a.shape[1])))

    xp = pad2(x, b_pad, i_pad)
    wmu_p = pad2(wmu_t, i_pad, o_pad)
    wrho_p = pad2(wrho_t, i_pad, o_pad)
    epsw_p = pad2(epsw_t, i_pad, o_pad)
    bmu_p = pad2(bmu2, 1, o_pad)
    brho_p = pad2(brho2, 1, o_pad)
    epsb_p = pad2(epsb2, 1, o_pad)

    n_j = o_pad // tile_o
    n_k = i_pad // tile_i

    kernel = _make_kernel(prior_std, in_features, out_features, tile_i, tile_o,
                          mask_rows=(i_pad != in_features),
                          mask_cols=(o_pad != out_features))

    grid_spec = pltpu.PrefetchScalarGridSpec(
        num_scalar_prefetch=0,
        grid=(n_j, n_k),
        in_specs=[
            pl.BlockSpec((b_pad, tile_i), lambda j, k: (0, k)),   # x
            pl.BlockSpec((tile_i, tile_o), lambda j, k: (k, j)),  # weight_mu  [I, O]
            pl.BlockSpec((tile_i, tile_o), lambda j, k: (k, j)),  # weight_rho [I, O]
            pl.BlockSpec((1, tile_o), lambda j, k: (0, j)),       # bias_mu
            pl.BlockSpec((1, tile_o), lambda j, k: (0, j)),       # bias_rho
            pl.BlockSpec((tile_i, tile_o), lambda j, k: (k, j)),  # eps_w      [I, O]
            pl.BlockSpec((1, tile_o), lambda j, k: (0, j)),       # eps_b
        ],
        out_specs=(
            pl.BlockSpec((b_pad, tile_o), lambda j, k: (0, j)),   # out (resident over k)
            pl.BlockSpec((1, 1), lambda j, k: (j, 0),             # KL partial per j-tile
                         memory_space=pltpu.MemorySpace.SMEM),
        ),
        scratch_shapes=[
            pltpu.VMEM((b_pad, tile_o), jnp.float32),             # output accumulator
            pltpu.SMEM((1, 1), jnp.float32),                      # KL accumulator
        ],
    )

    out_p, kl_parts = pl.pallas_call(
        kernel,
        out_shape=(
            jax.ShapeDtypeStruct((b_pad, o_pad), x.dtype),
            jax.ShapeDtypeStruct((n_j, 1), jnp.float32),
        ),
        grid_spec=grid_spec,
        compiler_params=pltpu.CompilerParams(
            dimension_semantics=("parallel", "arbitrary")),
    )(xp, wmu_p, wrho_p, bmu_p, brho_p, epsw_p, epsb_p)

    return out_p[:batch, :out_features], jnp.sum(kl_parts)


def _reference(x, weight_mu, weight_rho, bias_mu, bias_rho, eps_w, eps_b,
               prior_std: float = 1.0):
    wsig = jnp.log1p(jnp.exp(weight_rho))
    bsig = jnp.log1p(jnp.exp(bias_rho))
    w = weight_mu + wsig * eps_w
    b = bias_mu + bsig * eps_b
    out = jnp.dot(x, w.T, precision=jax.lax.Precision.HIGHEST) + b

    def kl(mu, sigma):
        return jnp.sum(jnp.log(prior_std) - jnp.log(sigma)
                       + (sigma ** 2 + mu ** 2) / (2.0 * prior_std ** 2) - 0.5)

    return out, kl(weight_mu, wsig) + kl(bias_mu, bsig)


def _run_case(key, batch, in_features, out_features, prior_std,
              out_tol, kl_tol):
    kx, kwm, kwr, kbm, kbr, kew, keb = jax.random.split(key, 7)

    x = jax.random.normal(kx, (batch, in_features), dtype=jnp.float32)
    weight_mu = 0.1 * jax.random.normal(kwm, (out_features, in_features), jnp.float32)
    weight_rho = -1.0 + 0.1 * jax.random.normal(kwr, (out_features, in_features), jnp.float32)
    bias_mu = 0.1 * jax.random.normal(kbm, (out_features,), jnp.float32)
    bias_rho = -1.0 + 0.1 * jax.random.normal(kbr, (out_features,), jnp.float32)
    eps_w = jax.random.normal(kew, (out_features, in_features), jnp.float32)
    eps_b = jax.random.normal(keb, (out_features,), jnp.float32)

    out, kl = bayesian_linear(x, weight_mu, weight_rho, bias_mu, bias_rho,
                              eps_w, eps_b, prior_std)
    jax.block_until_ready((out, kl))

    ref_out, ref_kl = _reference(x, weight_mu, weight_rho, bias_mu, bias_rho,
                                 eps_w, eps_b, prior_std)
    assert out.shape == (batch, out_features)
    assert jnp.allclose(out, ref_out, atol=out_tol, rtol=out_tol), \
        f"out mismatch: max diff {jnp.max(jnp.abs(out - ref_out))}"
    assert jnp.allclose(kl, ref_kl, atol=kl_tol, rtol=1e-4), \
        f"kl mismatch: {kl} vs {ref_kl}"


if __name__ == "__main__":
    key = jax.random.PRNGKey(0)
    k1, k2 = jax.random.split(key)

    # Small shape consistent with the module (single-tile grid after padding).
    _run_case(k1, batch=8, in_features=32, out_features=16, prior_std=1.0,
              out_tol=1e-4, kl_tol=1e-3)

    # Non-aligned, multi-tile reduction shape (exercises masking + k-accumulation).
    _run_case(k2, batch=16, in_features=300, out_features=200, prior_std=1.0,
              out_tol=1e-3, kl_tol=1e-1)

    print("KERNEL_OK")
</pallas_src>

<mosaic_0001>
module attributes {stable_mosaic.version = 11 : i64} {
  func.func @kernel(%arg0: i32, %arg1: i32, %arg2: memref<8x128xf32, #tpu.memory_space<vmem>>, %arg3: memref<128x128xf32, #tpu.memory_space<vmem>>, %arg4: memref<128x128xf32, #tpu.memory_space<vmem>>, %arg5: memref<1x128xf32, #tpu.memory_space<vmem>>, %arg6: memref<1x128xf32, #tpu.memory_space<vmem>>, %arg7: memref<128x128xf32, #tpu.memory_space<vmem>>, %arg8: memref<1x128xf32, #tpu.memory_space<vmem>>, %arg9: memref<8x128xf32, #tpu.memory_space<vmem>>, %arg10: memref<1x1xf32, #tpu.memory_space<smem>>, %arg11: memref<8x128xf32, #tpu.memory_space<vmem>>, %arg12: memref<1x1xf32, #tpu.memory_space<smem>>) attributes {dimension_semantics = [#tpu.dimension_semantics<parallel>, #tpu.dimension_semantics<arbitrary>], iteration_bounds = array<i64: 1, 1>, scalar_prefetch = 0 : i64, scratch_operands = 2 : i64, tpu.core_type = #tpu.core_type<tc>, window_params = [{transform_indices = @transform_0, window_bounds = array<i64: 8, 128>}, {transform_indices = @transform_1, window_bounds = array<i64: 128, 128>}, {transform_indices = @transform_2, window_bounds = array<i64: 128, 128>}, {transform_indices = @transform_3, window_bounds = array<i64: 1, 128>}, {transform_indices = @transform_4, window_bounds = array<i64: 1, 128>}, {transform_indices = @transform_5, window_bounds = array<i64: 128, 128>}, {transform_indices = @transform_6, window_bounds = array<i64: 1, 128>}, {transform_indices = @transform_7, window_bounds = array<i64: 8, 128>}, {transform_indices = @transform_8, window_bounds = array<i64: 1, 1>}]} {
    %c0_i32 = arith.constant 0 : i32
    %0 = arith.cmpi eq, %arg1, %c0_i32 : i32
    %1 = arith.extui %0 : i1 to i32
    %c0_i32_0 = arith.constant 0 : i32
    %2 = arith.cmpi ne, %1, %c0_i32_0 : i32
    scf.if %2 {
      %cst_26 = arith.constant 0.000000e+00 : f32
      %56 = vector.broadcast %cst_26 : f32 to vector<8x128xf32>
      %c0_27 = arith.constant 0 : index
      %c0_28 = arith.constant 0 : index
      %57 = vector.load %arg11[%c0_27, %c0_28] : memref<8x128xf32, #tpu.memory_space<vmem>>, vector<8x128xf32>
      tpu.vector_store %arg11[%c0_27, %c0_28], %56 {strides = array<i32>} : memref<8x128xf32, #tpu.memory_space<vmem>>, vector<8x128xf32>,
      %cst_29 = arith.constant 0.000000e+00 : f32
      %c0_30 = arith.constant 0 : index
      %c0_31 = arith.constant 0 : index
      %58 = memref.load %arg12[%c0_30, %c0_31] : memref<1x1xf32, #tpu.memory_space<smem>>
      memref.store %cst_29, %arg12[%c0_30, %c0_31] : memref<1x1xf32, #tpu.memory_space<smem>>
    } else {
    }
    %c0 = arith.constant 0 : index
    %c0_1 = arith.constant 0 : index
    %3 = vector.load %arg3[%c0, %c0_1] : memref<128x128xf32, #tpu.memory_space<vmem>>, vector<128x128xf32>
    %c0_2 = arith.constant 0 : index
    %c0_3 = arith.constant 0 : index
    %4 = vector.load %arg4[%c0_2, %c0_3] : memref<128x128xf32, #tpu.memory_space<vmem>>, vector<128x128xf32>
    %cst = arith.constant 2.000000e+01 : f32
    %5 = vector.broadcast %cst : f32 to vector<128x128xf32>
    %6 = arith.cmpf ogt, %4, %5 : vector<128x128xf32>
    %cst_4 = arith.constant 2.000000e+01 : f32
    %7 = vector.broadcast %cst_4 : f32 to vector<128x128xf32>
    %8 = arith.minimumf %4, %7 : vector<128x128xf32>
    %9 = math.exp %8 : vector<128x128xf32>
    %10 = math.log1p %9 : vector<128x128xf32>
    %11 = arith.select %6, %4, %10 : vector<128x128xi1>, vector<128x128xf32>
    %c0_5 = arith.constant 0 : index
    %c0_6 = arith.constant 0 : index
    %12 = vector.load %arg7[%c0_5, %c0_6] : memref<128x128xf32, #tpu.memory_space<vmem>>, vector<128x128xf32>
    %13 = arith.mulf %11, %12 : vector<128x128xf32>
    %14 = arith.addf %3, %13 : vector<128x128xf32>
    %c0_7 = arith.constant 0 : index
    %c0_8 = arith.constant 0 : index
    %15 = vector.load %arg11[%c0_7, %c0_8] : memref<8x128xf32, #tpu.memory_space<vmem>>, vector<8x128xf32>
    %c0_9 = arith.constant 0 : index
    %c0_10 = arith.constant 0 : index
    %16 = vector.load %arg2[%c0_9, %c0_10] : memref<8x128xf32, #tpu.memory_space<vmem>>, vector<8x128xf32>
    %cst_11 = arith.constant dense<0.000000e+00> : vector<8x128xf32>
    %17 = tpu.matmul %16, %14, %cst_11 {dimension_numbers = #tpu.dot_dimension_numbers<[1], [0], [0], [1], [0, 0, 1, 1], [], []>} : vector<8x128xf32>, vector<128x128xf32>, vector<8x128xf32> -> vector<8x128xf32>
    %18 = arith.addf %15, %17 : vector<8x128xf32>
    %c0_12 = arith.constant 0 : index
    %c0_13 = arith.constant 0 : index
    %19 = vector.load %arg11[%c0_12, %c0_13] : memref<8x128xf32, #tpu.memory_space<vmem>>, vector<8x128xf32>
    tpu.vector_store %arg11[%c0_12, %c0_13], %18 {strides = array<i32>} : memref<8x128xf32, #tpu.memory_space<vmem>>, vector<8x128xf32>,
    %20 = math.log %11 : vector<128x128xf32>
    %cst_14 = arith.constant 0.000000e+00 : f32
    %21 = vector.broadcast %cst_14 : f32 to vector<128x128xf32>
    %22 = arith.subf %21, %20 : vector<128x128xf32>
    %23 = arith.mulf %11, %11 : vector<128x128xf32>
    %24 = arith.mulf %3, %3 : vector<128x128xf32>
    %25 = arith.addf %23, %24 : vector<128x128xf32>
    %cst_15 = arith.constant 5.000000e-01 : f32
    %26 = vector.broadcast %cst_15 : f32 to vector<128x128xf32>
    %27 = arith.mulf %25, %26 : vector<128x128xf32>
    %28 = arith.addf %22, %27 : vector<128x128xf32>
    %cst_16 = arith.constant 5.000000e-01 : f32
    %29 = vector.broadcast %cst_16 : f32 to vector<128x128xf32>
    %30 = arith.subf %28, %29 : vector<128x128xf32>
    %c128_i32 = arith.constant 128 : i32
    %31 = arith.muli %arg1, %c128_i32 : i32
    %32 = tpu.iota {dimensions = array<i32: 0>} : vector<128x128xi32>
    %33 = vector.broadcast %31 : i32 to vector<128x128xi32>
    %34 = arith.addi %33, %32 : vector<128x128xi32>
    %c128_i32_17 = arith.constant 128 : i32
    %35 = arith.muli %arg0, %c128_i32_17 : i32
    %36 = tpu.iota {dimensions = array<i32: 1>} : vector<128x128xi32>
    %37 = vector.broadcast %35 : i32 to vector<128x128xi32>
    %38 = arith.addi %37, %36 : vector<128x128xi32>
    %c32_i32 = arith.constant 32 : i32
    %39 = vector.broadcast %c32_i32 : i32 to vector<128x128xi32>
    %40 = arith.cmpi slt, %34, %39 : vector<128x128xi32>
    %c16_i32 = arith.constant 16 : i32
    %41 = vector.broadcast %c16_i32 : i32 to vector<128x128xi32>
    %42 = arith.cmpi slt, %38, %41 : vector<128x128xi32>
    %43 = arith.andi %40, %42 : vector<128x128xi1>
    %cst_18 = arith.constant 0.000000e+00 : f32
    %44 = vector.broadcast %cst_18 : f32 to vector<128x128xf32>
    %45 = arith.select %43, %30, %44 : vector<128x128xi1>, vector<128x128xf32>
    %c0_19 = arith.constant 0 : index
    %c0_20 = arith.constant 0 : index
    %46 = memref.load %arg12[%c0_19, %c0_20] : memref<1x1xf32, #tpu.memory_space<smem>>
    %47 = vector.shape_cast %45 : vector<128x128xf32> to vector<1x128x128xf32>
    %cst_21 = arith.constant dense<0.000000e+00> : vector<1xf32>
    %48 = vector.multi_reduction <add>, %47, %cst_21 [1, 2] : vector<1x128x128xf32> to vector<1xf32>
    %49 = vector.shape_cast %48 : vector<1xf32> to vector<1x1x1xf32>
    %50 = vector.extract %49[0, 0, 0] : f32 from vector<1x1x1xf32>
    %51 = arith.addf %46, %50 : f32
    %c0_22 = arith.constant 0 : index
    %c0_23 = arith.constant 0 : index
    %52 = memref.load %arg12[%c0_22, %c0_23] : memref<1x1xf32, #tpu.memory_space<smem>>
    memref.store %51, %arg12[%c0_22, %c0_23] : memref<1x1xf32, #tpu.memory_space<smem>>
    %c0_i32_24 = arith.constant 0 : i32
    %53 = arith.cmpi eq, %arg1, %c0_i32_24 : i32
    %54 = arith.extui %53 : i1 to i32
    %c0_i32_25 = arith.constant 0 : i32
    %55 = arith.cmpi ne, %54, %c0_i32_25 : i32
    scf.if %55 {
      %c0_26 = arith.constant 0 : index
      %c0_27 = arith.constant 0 : index
      %56 = vector.load %arg5[%c0_26, %c0_27] : memref<1x128xf32, #tpu.memory_space<vmem>>, vector<1x128xf32>
      %c0_28 = arith.constant 0 : index
      %c0_29 = arith.constant 0 : index
      %57 = vector.load %arg6[%c0_28, %c0_29] : memref<1x128xf32, #tpu.memory_space<vmem>>, vector<1x128xf32>
      %cst_30 = arith.constant 2.000000e+01 : f32
      %58 = vector.broadcast %cst_30 : f32 to vector<1x128xf32>
      %59 = arith.cmpf ogt, %57, %58 : vector<1x128xf32>
      %cst_31 = arith.constant 2.000000e+01 : f32
      %60 = vector.broadcast %cst_31 : f32 to vector<1x128xf32>
      %61 = arith.minimumf %57, %60 : vector<1x128xf32>
      %62 = math.exp %61 : vector<1x128xf32>
      %63 = math.log1p %62 : vector<1x128xf32>
      %64 = arith.select %59, %57, %63 : vector<1x128xi1>, vector<1x128xf32>
      %c0_32 = arith.constant 0 : index
      %c0_33 = arith.constant 0 : index
      %65 = vector.load %arg8[%c0_32, %c0_33] : memref<1x128xf32, #tpu.memory_space<vmem>>, vector<1x128xf32>
      %66 = arith.mulf %64, %65 : vector<1x128xf32>
      %67 = arith.addf %56, %66 : vector<1x128xf32>
      %c0_34 = arith.constant 0 : index
      %c0_35 = arith.constant 0 : index
      %68 = vector.load %arg11[%c0_34, %c0_35] : memref<8x128xf32, #tpu.memory_space<vmem>>, vector<8x128xf32>
      %69 = vector.broadcast %67 : vector<1x128xf32> to vector<8x128xf32>
      %70 = arith.addf %68, %69 : vector<8x128xf32>
      %c0_36 = arith.constant 0 : index
      %c0_37 = arith.constant 0 : index
      %71 = vector.load %arg9[%c0_36, %c0_37] : memref<8x128xf32, #tpu.memory_space<vmem>>, vector<8x128xf32>
      tpu.vector_store %arg9[%c0_36, %c0_37], %70 {strides = array<i32>} : memref<8x128xf32, #tpu.memory_space<vmem>>, vector<8x128xf32>,
      %72 = math.log %64 : vector<1x128xf32>
      %cst_38 = arith.constant 0.000000e+00 : f32
      %73 = vector.broadcast %cst_38 : f32 to vector<1x128xf32>
      %74 = arith.subf %73, %72 : vector<1x128xf32>
      %75 = arith.mulf %64, %64 : vector<1x128xf32>
      %76 = arith.mulf %56, %56 : vector<1x128xf32>
      %77 = arith.addf %75, %76 : vector<1x128xf32>
      %cst_39 = arith.constant 5.000000e-01 : f32
      %78 = vector.broadcast %cst_39 : f32 to vector<1x128xf32>
      %79 = arith.mulf %77, %78 : vector<1x128xf32>
      %80 = arith.addf %74, %79 : vector<1x128xf32>
      %cst_40 = arith.constant 5.000000e-01 : f32
      %81 = vector.broadcast %cst_40 : f32 to vector<1x128xf32>
      %82 = arith.subf %80, %81 : vector<1x128xf32>
      %c128_i32_41 = arith.constant 128 : i32
      %83 = arith.muli %arg0, %c128_i32_41 : i32
      %84 = tpu.iota {dimensions = array<i32: 1>} : vector<1x128xi32>
      %85 = vector.broadcast %83 : i32 to vector<1x128xi32>
      %86 = arith.addi %85, %84 : vector<1x128xi32>
      %c16_i32_42 = arith.constant 16 : i32
      %87 = vector.broadcast %c16_i32_42 : i32 to vector<1x128xi32>
      %88 = arith.cmpi slt, %86, %87 : vector<1x128xi32>
      %cst_43 = arith.constant 0.000000e+00 : f32
      %89 = vector.broadcast %cst_43 : f32 to vector<1x128xf32>
      %90 = arith.select %88, %82, %89 : vector<1x128xi1>, vector<1x128xf32>
      %c0_44 = arith.constant 0 : index
      %c0_45 = arith.constant 0 : index
      %91 = memref.load %arg12[%c0_44, %c0_45] : memref<1x1xf32, #tpu.memory_space<smem>>
      %92 = vector.shape_cast %90 : vector<1x128xf32> to vector<1x1x128xf32>
      %cst_46 = arith.constant dense<0.000000e+00> : vector<1xf32>
      %93 = vector.multi_reduction <add>, %92, %cst_46 [1, 2] : vector<1x1x128xf32> to vector<1xf32>
      %94 = vector.shape_cast %93 : vector<1xf32> to vector<1x1x1xf32>
      %95 = vector.extract %94[0, 0, 0] : f32 from vector<1x1x1xf32>
      %96 = arith.addf %91, %95 : f32
      %c0_47 = arith.constant 0 : index
      %c0_48 = arith.constant 0 : index
      %97 = memref.load %arg10[%c0_47, %c0_48] : memref<1x1xf32, #tpu.memory_space<smem>>
      memref.store %96, %arg10[%c0_47, %c0_48] : memref<1x1xf32, #tpu.memory_space<smem>>
    } else {
    }
    return
  }
  func.func @transform_0(%arg0: i32, %arg1: i32) -> (i32, i32) {
    %c0_i32 = arith.constant 0 : i32
    %c0_i32_0 = arith.constant 0 : i32
    return %c0_i32, %arg1 : i32, i32
  }
  func.func @transform_1(%arg0: i32, %arg1: i32) -> (i32, i32) {
    %c0_i32 = arith.constant 0 : i32
    return %arg1, %arg0 : i32, i32
  }
  func.func @transform_2(%arg0: i32, %arg1: i32) -> (i32, i32) {
    %c0_i32 = arith.constant 0 : i32
    return %arg1, %arg0 : i32, i32
  }
  func.func @transform_3(%arg0: i32, %arg1: i32) -> (i32, i32) {
    %c0_i32 = arith.constant 0 : i32
    %c0_i32_0 = arith.constant 0 : i32
    return %c0_i32, %arg0 : i32, i32
  }
  func.func @transform_4(%arg0: i32, %arg1: i32) -> (i32, i32) {
    %c0_i32 = arith.constant 0 : i32
    %c0_i32_0 = arith.constant 0 : i32
    return %c0_i32, %arg0 : i32, i32
  }
  func.func @transform_5(%arg0: i32, %arg1: i32) -> (i32, i32) {
    %c0_i32 = arith.constant 0 : i32
    return %arg1, %arg0 : i32, i32
  }
  func.func @transform_6(%arg0: i32, %arg1: i32) -> (i32, i32) {
    %c0_i32 = arith.constant 0 : i32
    %c0_i32_0 = arith.constant 0 : i32
    return %c0_i32, %arg0 : i32, i32
  }
  func.func @transform_7(%arg0: i32, %arg1: i32) -> (i32, i32) {
    %c0_i32 = arith.constant 0 : i32
    %c0_i32_0 = arith.constant 0 : i32
    return %c0_i32, %arg0 : i32, i32
  }
  func.func @transform_8(%arg0: i32, %arg1: i32) -> (i32, i32) {
    %c0_i32 = arith.constant 0 : i32
    %c0_i32_0 = arith.constant 0 : i32
    return %arg0, %c0_i32 : i32, i32
  }
}

</mosaic_0001>

<bundles_post_ra>
// kernel: tpu_custom_call.1
= control target key start
LH: loop header
LB: loop body
LE: loop exit
PB: predicated region body
PF: predicated region fallthrough
CT: control target
= control target key end

     0   :  { %14 = vsyncpa [#allocation5], 0  ;;  %s1599_s0 = inlined_call_operand.hbm [shape: f32[8,128], index: 0, kind: input, shape index: {}]   ;;  %s1600_s1 = inlined_call_operand.hbm [shape: f32[128,128], index: 1, kind: input, shape index: {}]   ;;  %s1601_s2 = inlined_call_operand.hbm [shape: f32[128,128], index: 2, kind: input, shape index: {}]   ;;  %s1602_s3 = inlined_call_operand.vmem [shape: f32[1,128], index: 3, kind: input, shape index: {}]   ;;  %s1603_s4 = inlined_call_operand.vmem [shape: f32[1,128], index: 4, kind: input, shape index: {}]   ;;  %s1604_s5 = inlined_call_operand.hbm [shape: f32[128,128], index: 5, kind: input, shape index: {}]   ;;  %s1605_s6 = inlined_call_operand.vmem [shape: f32[1,128], index: 6, kind: input, shape index: {}]   ;;  %s1606_s7 = inlined_call_operand.hbm [shape: f32[8,128], index: 7, kind: output, shape index: {0}]   ;;  %s1607_s8 = inlined_call_operand.hbm [shape: f32[1,1], index: 8, kind: output, shape index: {1}]  }
   0x1   :  { %15 = vsyncpa [#allocation9], 0 }
   0x2   :  { %16 = vsyncpa [#allocation12], 0 }
   0x3   :  { %17 = vsyncpa [#allocation6], 0 }
   0x4   :  { %18 = vsyncpa [#allocation7], 0  ;;  %s1131_s27 = smov [#allocation8]   ;;  %s1001_s9 = scalar_lea.hbm %s1600_s1, 2048 }
   0x5   :  { %s34_s28 = sshll.u32 %s1131_s27, 4  ;;  %p1002_p0 = scmp.ne.s32.totalorder %s1600_s1, %s1001_s9  ;;  %s35_s28 = int_to_ptr.vmem [resolvable:$true] %s34_s28 }
   0x6   :  { %p1005_p1 = scmp.lt.u32.totalorder %s1001_s9, %s1600_s1 }
   0x8   :  { %p1007_p2 = pnand %p1005_p1, %p1002_p0 }
   0xa   :  { %1010 = shalt.err (!%p1007_p2)
}
   0xb   :  { %s1011_s14 = scalar_lea.vmem %s35_s28, 2048  ;;  %p1016_p4 = scmp.lt.s32.totalorder %s35_s28, %s35_s28 }
   0xc   :  { %p1012_p3 = scmp.ne.s32.totalorder %s35_s28, %s1011_s14  ;;  %p1017_p5 = scmp.lt.s32.totalorder %s1011_s14, %s1011_s14 }
   0xe   :  { %p1018_p6 = por %p1017_p5, %p1016_p4 }
  0x10   :  { %p1019_p7 = pnand %p1018_p6, %p1012_p3 }
  0x12   :  { %1022 = shalt.err (!%p1019_p7)
}
  0x13   :  { %s1132_s15 = smov 128   ;;  %s1133_s16 = smov 8  }
  0x14   :  { %40 = dma.hbm_to_vmem [thread:$0]  %s1600_s1, 2048, %s35_s28, [#allocation9], %s1132_s15, %s1132_s15, %s1133_s16  }
  0x15   :  { %s1134_s19 = smov [#allocation4]   ;;  %s1135_s21 = smov [#allocation10]  }
  0x16   :  { %s25_s20 = sshll.u32 %s1134_s19, 4  ;;  %s46_s22 = sshll.u32 %s1135_s21, 4  ;;  %s26_s20 = int_to_ptr.vmem [resolvable:$true] %s25_s20  ;;  %s47_s22 = int_to_ptr.vmem [resolvable:$true] %s46_s22 }
  0x17   :  { %s1023_s25 = scalar_lea.hbm %s1599_s0, 128 }
  0x18   :  { %p1024_p8 = scmp.ne.s32.totalorder %s1599_s0, %s1023_s25  ;;  %p1027_p9 = scmp.lt.u32.totalorder %s1023_s25, %s1599_s0 }
  0x1a   :  { %p1029_p10 = pnand %p1027_p9, %p1024_p8 }
  0x1c   :  { %1032 = shalt.err (!%p1029_p10)
}
  0x1d   :  { %s1033_s1 = scalar_lea.vmem %s26_s20, 128  ;;  %p1038_p12 = scmp.lt.s32.totalorder %s26_s20, %s26_s20 }
  0x1e   :  { %p1034_p11 = scmp.ne.s32.totalorder %s26_s20, %s1033_s1  ;;  %p1039_p13 = scmp.lt.s32.totalorder %s1033_s1, %s1033_s1 }
  0x20   :  { %p1040_p0 = por %p1039_p13, %p1038_p12 }
  0x22   :  { %p1041_p1 = pnand %p1040_p0, %p1034_p11 }
  0x24   :  { %1044 = shalt.err (!%p1041_p1)
}
  0x25   :  { %28 = dma.hbm_to_vmem [thread:$0]  %s1599_s0, 128, %s26_s20, [#allocation5]  }
  0x26   :  { %s1045_s12 = scalar_lea.hbm %s1601_s2, 2048 }
  0x27   :  { %p1046_p2 = scmp.ne.s32.totalorder %s1601_s2, %s1045_s12  ;;  %p1049_p3 = scmp.lt.u32.totalorder %s1045_s12, %s1601_s2 }
  0x29   :  { %p1051_p4 = pnand %p1049_p3, %p1046_p2 }
  0x2b   :  { %1054 = shalt.err (!%p1051_p4)
}
  0x2c   :  { %s1055_s19 = scalar_lea.vmem %s47_s22, 2048  ;;  %p1060_p6 = scmp.lt.s32.totalorder %s47_s22, %s47_s22 }
  0x2d   :  { %p1056_p5 = scmp.ne.s32.totalorder %s47_s22, %s1055_s19  ;;  %p1061_p7 = scmp.lt.s32.totalorder %s1055_s19, %s1055_s19 }
  0x2f   :  { %p1062_p8 = por %p1061_p7, %p1060_p6 }
  0x31   :  { %p1063_p9 = pnand %p1062_p8, %p1056_p5 }
  0x33   :  { %1066 = shalt.err (!%p1063_p9)
}
  0x34   :  { %52 = dma.hbm_to_vmem [thread:$0]  %s1601_s2, 2048, %s47_s22, [#allocation9], %s1132_s15, %s1132_s15, %s1133_s16  }
  0x35   :  { %s1136_s21 = smov [#allocation11]   ;;  %s1067_s26 = scalar_lea.hbm %s1604_s5, 2048 }
  0x36   :  { %s62_s23 = sshll.u32 %s1136_s21, 4  ;;  %p1068_p10 = scmp.ne.s32.totalorder %s1604_s5, %s1067_s26  ;;  %s63_s23 = int_to_ptr.vmem [resolvable:$true] %s62_s23 }
  0x37   :  { %p1071_p11 = scmp.lt.u32.totalorder %s1067_s26, %s1604_s5 }
  0x39   :  { %p1073_p12 = pnand %p1071_p11, %p1068_p10 }
  0x3b   :  { %1076 = shalt.err (!%p1073_p12)
}
  0x3c   :  { %s1077_s28 = scalar_lea.vmem %s63_s23, 2048  ;;  %p1082_p0 = scmp.lt.s32.totalorder %s63_s23, %s63_s23 }
  0x3d   :  { %p1078_p13 = scmp.ne.s32.totalorder %s63_s23, %s1077_s28  ;;  %p1083_p1 = scmp.lt.s32.totalorder %s1077_s28, %s1077_s28 }
  0x3f   :  { %p1084_p2 = por %p1083_p1, %p1082_p0 }
  0x41   :  { %p1085_p3 = pnand %p1084_p2, %p1078_p13 }
  0x43   :  { %1088 = shalt.err (!%p1085_p3)
}
  0x44   :  { %68 = dma.hbm_to_vmem [thread:$0]  %s1604_s5, 2048, %s63_s23, [#allocation12], %s1132_s15, %s1132_s15, %s1133_s16  }
  0x45   :  { %1121 = dma.done.wait [#allocation5], 128  }
  0x46   :  { %1122 = vsyncadd [#allocation5], 4294967168 }
  0x47   :  { %1123 = dma.done.wait [#allocation9], 4096  }
  0x48   :  { %1124 = vsyncadd [#allocation9], 4294963200 }
  0x49   :  { %1125 = dma.done.wait [#allocation12], 2048  }
  0x4a   :  { %1126 = vsyncadd [#allocation12], 4294965248  ;;  %v1137_v0 = vmov 0.0|0.0   ;;  %vm1138_vm0 = vmmov 0   ;;  %v1139_v1 = vmov 0.0   ;;  %v1245_v2 = vld [vmem:[#allocation10] sm:$0xff] }
  0x4b   :  { %884 = vmatprep.subr.bf16.mxu0 %v1137_v0  ;;  %881 = vmatprep.mubr.msk.f32.mxu0 %vm1138_vm0, %v1139_v1  ;;  %v1247_v3 = vld [vmem:[#allocation10 + $0x8] sm:$0xff]  ;;  %v138_v4 = vmin.f32 %v1245_v2, 20.0  ;;  %v1251_v6 = vld [vmem:[#allocation10 + $0x10] sm:$0xff]  ;;  %v1253_v8 = vld [vmem:[#allocation10 + $0x18] sm:$0xff]  ;;  %vm122_vm1 = vcmp.gt.f32.partialorder %v1245_v2, 20.0  ;;  %s1140_s10 = smov [#allocation13]  }
  0x4c   :  { %v139_v5 = vmin.f32 %v1247_v3, 20.0  ;;  %v140_v9 = vmin.f32 %v1251_v6, 20.0  ;;  %v141_v11 = vmin.f32 %v1253_v8, 20.0  ;;  %v1257_v13 = vld [vmem:[#allocation10 + $0x20] sm:$0xff]  ;;  %v1259_v14 = vld [vmem:[#allocation10 + $0x28] sm:$0xff]  ;;  %v1263_v18 = vld [vmem:[#allocation10 + $0x30] sm:$0xff] }
  0x4d   :  { %v154_v7 = vmul.f32 1.442695, %v138_v4  ;;  %v142_v16 = vmin.f32 %v1257_v13, 20.0  ;;  %v143_v17 = vmin.f32 %v1259_v14, 20.0  ;;  %v1265_v19 = vld [vmem:[#allocation10 + $0x38] sm:$0xff]  ;;  %v144_v20 = vmin.f32 %v1263_v18, 20.0 }
  0x4e   :  { %v156_v10 = vmul.f32 1.442695, %v139_v5  ;;  %v158_v12 = vmul.f32 1.442695, %v140_v9  ;;  %v160_v15 = vmul.f32 1.442695, %v141_v11 }
  0x4f   :  { %923 = vpow2.f32 %v154_v7  ;;  %v162_v21 = vmul.f32 1.442695, %v142_v16  ;;  %v164_v22 = vmul.f32 1.442695, %v143_v17  ;;  %v145_v23 = vmin.f32 %v1265_v19, 20.0  ;;  %v1269_v25 = vld [vmem:[#allocation10 + $0x40] sm:$0xff] }
  0x50   :  { %925 = vpow2.f32 %v156_v10  ;;  %v166_v24 = vmul.f32 1.442695, %v144_v20  ;;  %v1271_v27 = vld [vmem:[#allocation10 + $0x48] sm:$0xff]  ;;  %v146_v28 = vmin.f32 %v1269_v25, 20.0  ;;  %v1274_v30 = vld [vmem:[#allocation10 + $0x50] sm:$0xff]  ;;  %v1277_v34 = vld [vmem:[#allocation8] sm:$0xff] }
  0x51   :  { %927 = vpow2.f32 %v158_v12  ;;  %v168_v26 = vmul.f32 1.442695, %v145_v23  ;;  %v147_v31 = vmin.f32 %v1271_v27, 20.0  ;;  %v1279_v35 = vld [vmem:[#allocation8 + $0x8] sm:$0xff]  ;;  %v1281_v38 = vld [vmem:[#allocation10 + $0x58] sm:$0xff]  ;;  %v148_v39 = vmin.f32 %v1274_v30, 20.0 }
  0x52   :  { %929 = vpow2.f32 %v160_v15  ;;  %v170_v29 = vmul.f32 1.442695, %v146_v28  ;;  %v1286_v43 = vmul.f32 %v1277_v34, %v1277_v34  ;;  %v1290_v44 = vmul.f32 %v1279_v35, %v1279_v35  ;;  %v348_v4 = vld [vmem:[#allocation11 + $0x10] sm:$0xff]  ;;  %s791_s11 = sshll.u32 %s1140_s10, 4  ;;  %s792_s11 = int_to_ptr.vmem [resolvable:$true] %s791_s11 }
  0x53   :  { %931 = vpow2.f32 %v162_v21  ;;  %v172_v48 = vmul.f32 1.442695, %v147_v31  ;;  %v149_v51 = vmin.f32 %v1281_v38, 20.0  ;;  %v1293_v54 = vmul.f32 1.442695, %v148_v39  ;;  %s1089_s12 = scalar_lea.vmem %s792_s11, 128  ;;  %p1094_p5 = scmp.lt.s32.totalorder %s792_s11, %s792_s11 }
  0x54   :  { %933 = vpow2.f32 %v164_v22  ;;  %vm123_vm2 = vcmp.gt.f32.partialorder %v1247_v3, 20.0  ;;  %vm124_vm5 = vcmp.gt.f32.partialorder %v1251_v6, 20.0  ;;  %vm125_vm7 = vcmp.gt.f32.partialorder %v1253_v8, 20.0  ;;  %p1090_p4 = scmp.ne.s32.totalorder %s792_s11, %s1089_s12  ;;  %p1095_p6 = scmp.lt.s32.totalorder %s1089_s12, %s1089_s12 }
  0x55   :  { %935 = vpow2.f32 %v166_v24  ;;  %vm126_vm9 = vcmp.gt.f32.partialorder %v1257_v13, 20.0  ;;  %vm127_vm10 = vcmp.gt.f32.partialorder %v1259_v14, 20.0  ;;  %vm128_vm12 = vcmp.gt.f32.partialorder %v1263_v18, 20.0 }
  0x56   :  { %937 = vpow2.f32 %v168_v26  ;;  %vm129_vm14 = vcmp.gt.f32.partialorder %v1265_v19, 20.0  ;;  %p1096_p7 = por %p1095_p6, %p1094_p5 }
  0x57   :  { %939 = vpow2.f32 %v170_v29 }
  0x58   :  { %p1097_p8 = pnand %p1096_p7, %p1090_p4 }
  0x59   :  { %v924_v32 = vpop.eup %923 }
  0x5a   :  { %v926_v33 = vpop.eup %925  ;;  %v186_v36 = vadd.f32 1.0, %v924_v32  ;;  %v189_v37 = vmul.f32 -0.5, %v924_v32  ;;  %v192_v46 = vand.u32 2147483647, %v924_v32 }
  0x5b   :  { %v928_v40 = vpop.eup %927  ;;  %v195_v41 = vadd.f32 1.0, %v926_v33  ;;  %v198_v42 = vmul.f32 -0.5, %v926_v33  ;;  %v201_v49 = vand.u32 2147483647, %v926_v33 }
  0x5c   :  { %v930_v45 = vpop.eup %929  ;;  %941 = vlog2.f32 %v186_v36  ;;  %v204_v47 = vadd.f32 1.0, %v928_v40  ;;  %v207_v50 = vmul.f32 -0.5, %v928_v40  ;;  %v190_v52 = vadd.f32 1.0, %v189_v37 }
  0x5d   :  { %943 = vlog2.f32 %v195_v41  ;;  %v213_v53 = vadd.f32 1.0, %v930_v45  ;;  %v932_v55 = vpop.eup %931  ;;  %v199_v56 = vadd.f32 1.0, %v198_v42  ;;  %v210_v58 = vand.u32 2147483647, %v928_v40  ;;  %v346_v41 = vld [vmem:[#allocation11] sm:$0xff] }
  0x5e   :  { %945 = vlog2.f32 %v204_v47  ;;  %v208_v57 = vadd.f32 1.0, %v207_v50  ;;  %v216_v59 = vmul.f32 -0.5, %v930_v45  ;;  %v934_v60 = vpop.eup %933  ;;  %vm1297_vm3 = vcmp.lt.f32.partialorder %v192_v46, 0.0004427343 }
  0x5f   :  { %947 = vlog2.f32 %v213_v53  ;;  %v222_v62 = vadd.f32 1.0, %v932_v55  ;;  %v225_v63 = vmul.f32 -0.5, %v932_v55  ;;  %v936_v1 = vpop.eup %935  ;;  %vm1301_vm4 = vcmp.lt.f32.partialorder %v201_v49, 0.0004427343  ;;  %v347_v53 = vld [vmem:[#allocation11 + $0x8] sm:$0xff] }
  0x60   :  { %v217_v5 = vadd.f32 1.0, %v216_v59  ;;  %v219_v7 = vand.u32 2147483647, %v930_v45  ;;  %949 = vpow2.f32 %v172_v48  ;;  %v1305_v9 = vpop.eup %937  ;;  %v191_v10 = vmul.f32 %v924_v32, %v190_v52 }
  0x61   :  { %951 = vlog2.f32 %v222_v62  ;;  %v231_v11 = vadd.f32 1.0, %v934_v60  ;;  %v234_v12 = vmul.f32 -0.5, %v934_v60  ;;  %v200_v15 = vmul.f32 %v926_v33, %v199_v56  ;;  %v1312_v21 = vpop.eup %939 }
  0x62   :  { %v209_v16 = vmul.f32 %v928_v40, %v208_v57  ;;  %vm1308_vm6 = vcmp.lt.f32.partialorder %v210_v58, 0.0004427343  ;;  %v240_v20 = vadd.f32 1.0, %v936_v1  ;;  %v226_v22 = vadd.f32 1.0, %v225_v63  ;;  %v353_v63 = vld [vmem:[#allocation11 + $0x38] sm:$0xff] }
  0x63   :  { %v228_v23 = vand.u32 2147483647, %v932_v55  ;;  %953 = vlog2.f32 %v231_v11  ;;  %v243_v24 = vmul.f32 -0.5, %v936_v1  ;;  %v1315_v26 = vmul.f32 %v930_v45, %v217_v5 }
  0x64   :  { %vm1317_vm8 = vcmp.lt.f32.partialorder %v219_v7, 0.0004427343  ;;  %955 = vlog2.f32 %v240_v20  ;;  %v249_v29 = vadd.f32 1.0, %v1305_v9  ;;  %v235_v32 = vadd.f32 1.0, %v234_v12 }
  0x65   :  { %v237_v33 = vand.u32 2147483647, %v934_v60  ;;  %v246_v36 = vand.u32 2147483647, %v936_v1  ;;  %v252_v37 = vmul.f32 -0.5, %v1305_v9  ;;  %v244_v42 = vadd.f32 1.0, %v243_v24 }
  0x66   :  { %v942_v31 = vpop.eup %941  ;;  %957 = vlog2.f32 %v249_v29  ;;  %v258_v45 = vadd.f32 1.0, %v1312_v21  ;;  %v227_v48 = vmul.f32 %v932_v55, %v226_v22  ;;  %vm1326_vm11 = vcmp.lt.f32.partialorder %v228_v23, 0.0004427343  ;;  %v1361_v22 = vld [vmem:[#allocation8 + $0x10] sm:$0xff]  ;;  %v349_v29 = vld [vmem:[#allocation11 + $0x18] sm:$0xff] }
  0x67   :  { %v944_v39 = vpop.eup %943  ;;  %v188_v40 = vmul.f32 0.6931472, %v942_v31  ;;  %v255_v50 = vand.u32 2147483647, %v1305_v9  ;;  %v253_v57 = vadd.f32 1.0, %v252_v37  ;;  %v236_v62 = vmul.f32 %v934_v60, %v235_v32 }
  0x68   :  { %v946_v46 = vpop.eup %945  ;;  %v197_v47 = vmul.f32 0.6931472, %v944_v39  ;;  %959 = vlog2.f32 %v258_v45  ;;  %vm1339_vm13 = vcmp.lt.f32.partialorder %v237_v33, 0.0004427343  ;;  %vm1349_vm15 = vcmp.lt.f32.partialorder %v246_v36, 0.0004427343 }
  0x69   :  { %v194_v52 = vsel %vm1297_vm3, %v191_v10, %v188_v40  ;;  %v206_v56 = vmul.f32 0.6931472, %v946_v46  ;;  %v948_v58 = vpop.eup %947  ;;  %v245_v10 = vmul.f32 %v936_v1, %v244_v42  ;;  %vm1355_vm0 = vcmp.lt.f32.partialorder %v255_v50, 0.0004427343  ;;  %v1375_v39 = vld [vmem:[#allocation8 + $0x18] sm:$0xff]  ;;  %v350_v40 = vld [vmem:[#allocation11 + $0x20] sm:$0xff] }
  0x6a   :  { %v203_v59 = vsel %vm1301_vm4, %v200_v15, %v197_v47  ;;  %v330_v55 = vsel %vm122_vm1, %v1245_v2, %v194_v52  ;;  %v1344_v61 = vpop.eup %949  ;;  %v261_v20 = vmul.f32 -0.5, %v1312_v21  ;;  %v215_v1 = vmul.f32 0.6931472, %v948_v58  ;;  %v94_v52 = vld [vmem:[#allocation8 + $0x20] sm:$0xff] }
  0x6b   :  { %v331_v5 = vsel %vm123_vm2, %v1247_v3, %v203_v59  ;;  %v362_v7 = vmul.f32 %v346_v41, %v330_v55  ;;  %v952_v2 = vpop.eup %951  ;;  %v212_v12 = vsel %vm1308_vm6, %v209_v16, %v206_v56  ;;  %v254_v24 = vmul.f32 %v1305_v9, %v253_v57  ;;  %v351_v41 = vld [vmem:[#allocation11 + $0x28] sm:$0xff] }
  0x6c   :  { %v363_v60 = vmul.f32 %v347_v53, %v331_v5  ;;  %v1366_v23 = vsel %vm124_vm5, %v1251_v6, %v212_v12  ;;  %961 = vlog2.f32 %v330_v55  ;;  %v224_v32 = vmul.f32 0.6931472, %v952_v2 }
  0x6d   :  { %v378_v3 = vadd.f32 %v362_v7, %v1277_v34  ;;  %v954_v17 = vpop.eup %953  ;;  %v364_v31 = vmul.f32 %v348_v4, %v1366_v23  ;;  %963 = vlog2.f32 %v331_v5  ;;  %v221_v34 = vsel %vm1317_vm8, %v1315_v26, %v215_v1 }
  0x6e   :  { %v379_v16 = vadd.f32 %v363_v60, %v1279_v35  ;;  %v956_v33 = vpop.eup %955  ;;  %v233_v36 = vmul.f32 0.6931472, %v954_v17  ;;  %v264_v6 = vand.u32 2147483647, %v1312_v21  ;;  %v1380_v35 = vsel %vm125_vm7, %v1253_v8, %v221_v34  ;;  %v95_v8 = vld [vmem:[#allocation8 + $0x28] sm:$0xff] }
  0x6f   :  { %v380_v9 = vadd.f32 %v364_v31, %v1361_v22  ;;  %v262_v42 = vadd.f32 1.0, %v261_v20  ;;  %v365_v28 = vmul.f32 %v349_v29, %v1380_v35  ;;  %v230_v26 = vsel %vm1326_vm11, %v227_v48, %v224_v32  ;;  %v96_v20 = vld [vmem:[#allocation8 + $0x30] sm:$0xff]  ;;  %v1416_v31 = vld [vmem:[#allocation10 + $0x68] sm:$0xff] }
  0x70   :  { %v885_v37 = vpack.c.bf16 %v379_v16, %v378_v3  ;;  %v958_v45 = vpop.eup %957  ;;  %v239_v46 = vsel %vm1339_vm13, %v236_v62, %v233_v36  ;;  %v242_v47 = vmul.f32 0.6931472, %v956_v33  ;;  %v516_v50 = vmul.f32 %v330_v55, %v330_v55  ;;  %v352_v62 = vld [vmem:[#allocation11 + $0x30] sm:$0xff]  ;;  %v97_v3 = vld [vmem:[#allocation8 + $0x38] sm:$0xff] }
  0x71   :  { %v334_v53 = vsel %vm126_vm9, %v1257_v13, %v230_v26  ;;  %v335_v56 = vsel %vm127_vm10, %v1259_v14, %v239_v46  ;;  %v251_v57 = vmul.f32 0.6931472, %v958_v45  ;;  %v381_v48 = vadd.f32 %v365_v28, %v1375_v39 }
  0x72   :  { %886 = vmatpush3.bf16.msra.mxu0 %v885_v37  ;;  %v960_v58 = vpop.eup %959  ;;  %v366_v49 = vmul.f32 %v350_v40, %v334_v53  ;;  %v367_v59 = vmul.f32 %v351_v41, %v335_v56  ;;  %v248_v55 = vsel %vm1349_vm15, %v245_v10, %v242_v47  ;;  %v517_v7 = vmul.f32 %v331_v5, %v331_v5  ;;  %v354_v47 = vld [vmem:[#allocation11 + $0x40] sm:$0xff] }
  0x73   :  { %887 = vmatprep.subr.bf16.mxu0 %v1137_v0  ;;  %v257_v13 = vsel %vm1355_vm0, %v254_v24, %v251_v57  ;;  %v336_v14 = vsel %vm128_vm12, %v1263_v18, %v248_v55  ;;  %v263_v4 = vmul.f32 %v1312_v21, %v262_v42  ;;  %v888_v2 = vpack.c.bf16 %v381_v48, %v380_v9 }
  0x74   :  { %v382_v60 = vadd.f32 %v366_v49, %v94_v52  ;;  %v383_v12 = vadd.f32 %v367_v59, %v95_v8  ;;  %v337_v10 = vsel %vm129_vm14, %v1265_v19, %v257_v13  ;;  %v368_v11 = vmul.f32 %v352_v62, %v336_v14  ;;  %v1414_v19 = vld [vmem:[#allocation10 + $0x60] sm:$0xff]  ;;  %v1441_v8 = vld [vmem:[#allocation10 + $0x78] sm:$0xff] }
  0x75   :  { %v369_v5 = vmul.f32 %v353_v63, %v337_v10  ;;  %v260_v1 = vmul.f32 0.6931472, %v960_v58  ;;  %v267_v15 = vadd.f32 1.0, %v1344_v61  ;;  %vm1408_vm1 = vcmp.lt.f32.partialorder %v264_v6, 0.0004427343  ;;  %v98_v63 = vld [vmem:[#allocation8 + $0x40] sm:$0xff] }
  0x76   :  { %889 = vmatpush3.bf16.msra.mxu0 %v888_v2  ;;  %v891_v24 = vpack.c.bf16 %v383_v12, %v382_v60  ;;  %v962_v21 = vpop.eup %961  ;;  %v548_v17 = vadd.f32 %v1286_v43, %v516_v50  ;;  %v384_v16 = vadd.f32 %v368_v11, %v96_v20  ;;  %v270_v33 = vmul.f32 -0.5, %v1344_v61  ;;  %v1465_v11 = vld [vmem:[%s1603_s4] sm:$0x1] }
  0x77   :  { %890 = vmatprep.subr.bf16.mxu0 %v1137_v0  ;;  %v385_v29 = vadd.f32 %v369_v5, %v97_v3  ;;  %965 = vlog2.f32 %v267_v15  ;;  %v964_v32 = vpop.eup %963  ;;  %v176_v34 = vmul.f32 1.442695, %v149_v51  ;;  %v648_v36 = vlaneseq }
  0x78   :  { %967 = vpow2.f32 %v1293_v54  ;;  %v549_v43 = vadd.f32 %v1290_v44, %v517_v7  ;;  %v534_v6 = vmul.f32 %v1361_v22, %v1361_v22  ;;  %vm130_vm2 = vcmp.gt.f32.partialorder %v1269_v25, 20.0  ;;  %v1432_v22 = vld [vmem:[#allocation10 + $0x70] sm:$0xff] }
  0x79   :  { %v266_v37 = vsel %vm1408_vm1, %v263_v4, %v260_v1  ;;  %v894_v9 = vpack.c.bf16 %v385_v29, %v384_v16  ;;  %969 = vpow2.f32 %v176_v34  ;;  %v150_v40 = vmin.f32 %v1414_v19, 20.0  ;;  %v99_v1 = vld [vmem:[#allocation8 + $0x48] sm:$0xff] }
  0x7a   :  { %892 = vmatpush3.bf16.msra.mxu0 %v891_v24  ;;  %v151_v54 = vmin.f32 %v1416_v31, 20.0  ;;  %v564_v41 = vmul.f32 0.5, %v548_v17  ;;  %v469_v51 = vmul.f32 0.6931472, %v962_v21  ;;  %v471_v44 = vmul.f32 0.6931472, %v964_v32 }
  0x7b   :  { %893 = vmatprep.subr.bf16.mxu0 %v1137_v0  ;;  %971 = vlog2.f32 %v1366_v23  ;;  %v271_v42 = vadd.f32 1.0, %v270_v33  ;;  %v178_v45 = vmul.f32 1.442695, %v150_v40  ;;  %v273_v26 = vand.u32 2147483647, %v1344_v61 }
  0x7c   :  { %v180_v28 = vmul.f32 1.442695, %v151_v54  ;;  %973 = vlog2.f32 %v1380_v35  ;;  %v338_v46 = vsel %vm130_vm2, %v1269_v25, %v266_v37  ;;  %v500_v50 = vsub.f32 0.0, %v469_v51 }
  0x7d   :  { %v518_v52 = vmul.f32 %v1366_v23, %v1366_v23  ;;  %v565_v53 = vmul.f32 0.5, %v549_v43  ;;  %975 = vpow2.f32 %v178_v45  ;;  %v501_v56 = vsub.f32 0.0, %v471_v44 }
  0x7e   :  { %895 = vmatpush3.bf16.msra.mxu0 %v894_v9  ;;  %v152_v57 = vmin.f32 %v1432_v22, 20.0  ;;  %977 = vpow2.f32 %v180_v28  ;;  %v519_v58 = vmul.f32 %v1380_v35, %v1380_v35  ;;  %v535_v25 = vmul.f32 %v1375_v39, %v1375_v39 }
  0x7f   :  { %896 = vmatprep.subr.bf16.mxu0 %v1137_v0  ;;  %v1450_v48 = vand.u32 127, %v648_v36  ;;  %v272_v23 = vmul.f32 %v1344_v61, %v271_v42  ;;  %v370_v49 = vmul.f32 %v354_v47, %v338_v46  ;;  %v153_v59 = vmin.f32 %v1441_v8, 20.0  ;;  %v355_v61 = vld [vmem:[#allocation11 + $0x48] sm:$0xff] }
  0x80   :  { %v182_v55 = vmul.f32 1.442695, %v152_v57  ;;  %vm131_vm3 = vcmp.gt.f32.partialorder %v1271_v27, 20.0  ;;  %vm1455_vm4 = vcmp.lt.f32.partialorder %v273_v26, 0.0004427343  ;;  %v550_v35 = vadd.f32 %v534_v6, %v518_v52 }
  0x81   :  { %v966_v62 = vpop.eup %965  ;;  %v580_v13 = vadd.f32 %v564_v41, %v500_v50  ;;  %v581_v4 = vadd.f32 %v565_v53, %v501_v56  ;;  %v184_v2 = vmul.f32 1.442695, %v153_v59  ;;  %v551_v12 = vadd.f32 %v535_v25, %v519_v58 }
  0x82   :  { %v968_v39 = vpop.eup %967  ;;  %v269_v14 = vmul.f32 0.6931472, %v966_v62  ;;  %979 = vpow2.f32 %v182_v55  ;;  %v386_v10 = vadd.f32 %v370_v49, %v98_v63  ;;  %vm668_vm5 = vcmp.lt.s32.totalorder %v1450_v48, 16  ;;  %v748_v48 = vld [vmem:[%s1605_s6] sm:$0x1] }
  0x83   :  { %v276_v60 = vadd.f32 1.0, %v968_v39  ;;  %v970_v20 = vpop.eup %969  ;;  %981 = vpow2.f32 %v184_v2  ;;  %v279_v24 = vmul.f32 -0.5, %v968_v39  ;;  %v815_v18 = vadd.f32 -0.5, %v580_v13 }
  0x84   :  { %v275_v3 = vsel %vm1455_vm4, %v272_v23, %v269_v14  ;;  %v285_v16 = vadd.f32 1.0, %v970_v20  ;;  %v566_v29 = vmul.f32 0.5, %v550_v35  ;;  %v816_v32 = vadd.f32 -0.5, %v581_v4 }
  0x85   :  { %v972_v5 = vpop.eup %971  ;;  %v339_v15 = vsel %vm131_vm3, %v1271_v27, %v275_v3  ;;  %983 = vlog2.f32 %v276_v60  ;;  %v288_v33 = vmul.f32 -0.5, %v970_v20  ;;  %v567_v43 = vmul.f32 0.5, %v551_v12  ;;  %v356_v3 = vld [vmem:[#allocation11 + $0x50] sm:$0xff] }
  0x86   :  { %v974_v21 = vpop.eup %973  ;;  %v371_v17 = vmul.f32 %v355_v61, %v339_v15  ;;  %v473_v34 = vmul.f32 0.6931472, %v972_v5  ;;  %v735_v6 = vmin.f32 %v1465_v11, 20.0  ;;  %vm132_vm6 = vcmp.gt.f32.partialorder %v1274_v30, 20.0 }
  0x87   :  { %v1471_v37 = vpop.eup %975  ;;  %v282_v40 = vand.u32 2147483647, %v968_v39  ;;  %985 = vlog2.f32 %v285_v16  ;;  %v475_v27 = vmul.f32 0.6931472, %v974_v21  ;;  %v280_v41 = vadd.f32 1.0, %v279_v24 }
  0x88   :  { %v387_v9 = vadd.f32 %v371_v17, %v99_v1  ;;  %v1474_v54 = vpop.eup %977  ;;  %v294_v51 = vadd.f32 1.0, %v1471_v37  ;;  %v502_v44 = vsub.f32 0.0, %v473_v34  ;;  %v685_v42 = vsel %vm668_vm5, %v815_v18, 0.0 }
  0x89   :  { %v291_v28 = vand.u32 2147483647, %v970_v20  ;;  %v303_v26 = vadd.f32 1.0, %v1474_v54  ;;  %v686_v46 = vsel %vm668_vm5, %v816_v32, 0.0  ;;  %vm133_vm7 = vcmp.gt.f32.partialorder %v1281_v38, 20.0  ;;  %v357_v32 = vld [vmem:[#allocation11 + $0x58] sm:$0xff] }
  0x8a   :  { %v897_v45 = vpack.c.bf16 %v387_v9, %v386_v10  ;;  %v289_v47 = vadd.f32 1.0, %v288_v33  ;;  %987 = vlog2.f32 %v294_v51  ;;  %v297_v50 = vmul.f32 -0.5, %v1471_v37  ;;  %v101_v51 = vld [vmem:[#allocation8 + $0x58] sm:$0xff] }
  0x8b   :  { %v736_v52 = vmul.f32 1.442695, %v735_v6  ;;  %vm1486_vm8 = vcmp.lt.f32.partialorder %v282_v40, 0.0004427343  ;;  %989 = vlog2.f32 %v303_v26  ;;  %v503_v57 = vsub.f32 0.0, %v475_v27 }
  0x8c   :  { %v1484_v53 = vpop.eup %979  ;;  %898 = vmatpush3.bf16.msra.mxu0 %v897_v45  ;;  %v582_v58 = vadd.f32 %v566_v29, %v502_v44  ;;  %v281_v25 = vmul.f32 %v968_v39, %v280_v41  ;;  %v306_v23 = vmul.f32 -0.5, %v1474_v54  ;;  %v702_v49 = vadd.f32 %v686_v46, %v685_v42  ;;  %v100_v29 = vld [vmem:[#allocation8 + $0x50] sm:$0xff] }
  0x8d   :  { %899 = vmatprep.subr.bf16.mxu0 %v1137_v0  ;;  %v312_v59 = vadd.f32 1.0, %v1484_v53  ;;  %v1493_v55 = vpop.eup %981  ;;  %vm1495_vm9 = vcmp.lt.f32.partialorder %v291_v28, 0.0004427343  ;;  %v300_v63 = vand.u32 2147483647, %v1471_v37  ;;  %v583_v7 = vadd.f32 %v567_v43, %v503_v57 }
  0x8e   :  { %v817_v35 = vadd.f32 -0.5, %v582_v58  ;;  %v290_v14 = vmul.f32 %v970_v20, %v289_v47  ;;  %v298_v4 = vadd.f32 1.0, %v297_v50  ;;  %v321_v39 = vadd.f32 1.0, %v1493_v55  ;;  %v358_v47 = vld [vmem:[#allocation11 + $0x60] sm:$0xff] }
  0x8f   :  { %v984_v13 = vpop.eup %983  ;;  %991 = vlog2.f32 %v312_v59  ;;  %v818_v61 = vadd.f32 -0.5, %v583_v7  ;;  %v315_v12 = vmul.f32 -0.5, %v1484_v53  ;;  %v307_v10 = vadd.f32 1.0, %v306_v23  ;;  %v102_v58 = vld [vmem:[#allocation8 + $0x60] sm:$0xff]  ;;  %v103_v59 = vld [vmem:[#allocation8 + $0x68] sm:$0xff] }
  0x90   :  { %v278_v2 = vmul.f32 0.6931472, %v984_v13  ;;  %v687_v60 = vsel %vm668_vm5, %v817_v35, 0.0  ;;  %v309_v5 = vand.u32 2147483647, %v1474_v54  ;;  %993 = vlog2.f32 %v321_v39 }
  0x91   :  { %v703_v1 = vadd.f32 %v702_v49, %v687_v60  ;;  %v986_v15 = vpop.eup %985  ;;  %v688_v24 = vsel %vm668_vm5, %v818_v61, 0.0  ;;  %v324_v18 = vmul.f32 -0.5, %v1493_v55  ;;  %995 = vpow2.f32 %v736_v52  ;;  %v359_v52 = vld [vmem:[#allocation11 + $0x68] sm:$0xff] }
  0x92   :  { %v284_v20 = vsel %vm1486_vm8, %v281_v25, %v278_v2  ;;  %v287_v21 = vmul.f32 0.6931472, %v986_v15  ;;  %vm134_vm10 = vcmp.gt.f32.partialorder %v1414_v19, 20.0  ;;  %vm135_vm11 = vcmp.gt.f32.partialorder %v1416_v31, 20.0 }
  0x93   :  { %v340_v17 = vsel %vm132_vm6, %v1274_v30, %v284_v20  ;;  %v704_v16 = vadd.f32 %v703_v1, %v688_v24  ;;  %v299_v34 = vmul.f32 %v1471_v37, %v298_v4  ;;  %v316_v43 = vadd.f32 1.0, %v315_v12  ;;  %v104_v12 = vld [vmem:[#allocation8 + $0x70] sm:$0xff]  ;;  %v105_v20 = vld [vmem:[#allocation8 + $0x78] sm:$0xff] }
  0x94   :  { %v372_v33 = vmul.f32 %v356_v3, %v340_v17  ;;  %v988_v6 = vpop.eup %987  ;;  %v293_v9 = vsel %vm1495_vm9, %v290_v14, %v287_v21  ;;  %vm1518_vm12 = vcmp.lt.f32.partialorder %v300_v63, 0.0004427343  ;;  %v308_v30 = vmul.f32 %v1474_v54, %v307_v10  ;;  %v361_v3 = vld [vmem:[#allocation11 + $0x78] sm:$0xff] }
  0x95   :  { %717 = vadd.xlane.f32.xlu0 %v704_v16  ;;  %v318_v27 = vand.u32 2147483647, %v1484_v53  ;;  %v990_v41 = vpop.eup %989  ;;  %v341_v37 = vsel %vm133_vm7, %v1281_v38, %v293_v9  ;;  %v296_v44 = vmul.f32 0.6931472, %v988_v6  ;;  %vm1527_vm13 = vcmp.lt.f32.partialorder %v309_v5, 0.0004427343 }
  0x96   :  { %v325_v45 = vadd.f32 1.0, %v324_v18  ;;  %v373_v28 = vmul.f32 %v357_v32, %v341_v37  ;;  %v388_v26 = vadd.f32 %v372_v33, %v100_v29  ;;  %v305_v46 = vmul.f32 0.6931472, %v990_v41  ;;  %v395_v33 = vld [vmem:[#allocation4] sm:$0xff] }
  0x97   :  { %v327_v54 = vand.u32 2147483647, %v1493_v55  ;;  %v302_v50 = vsel %vm1518_vm12, %v299_v34, %v296_v44  ;;  %vm136_vm14 = vcmp.gt.f32.partialorder %v1432_v22, 20.0  ;;  %v317_v38 = vmul.f32 %v1484_v53, %v316_v43 }
  0x98   :  { %v389_v57 = vadd.f32 %v373_v28, %v101_v51  ;;  %v311_v25 = vsel %vm1527_vm13, %v308_v30, %v305_v46  ;;  %v342_v23 = vsel %vm134_vm10, %v1414_v19, %v302_v50  ;;  %vm1541_vm15 = vcmp.lt.f32.partialorder %v318_v27, 0.0004427343  ;;  %v360_v19 = vld [vmem:[#allocation11 + $0x70] sm:$0xff] }
  0x99   :  { %v992_v56 = vpop.eup %991  ;;  %v343_v62 = vsel %vm135_vm11, %v1416_v31, %v311_v25  ;;  %v374_v53 = vmul.f32 %v358_v47, %v342_v23  ;;  %v326_v7 = vmul.f32 %v1493_v55, %v325_v45  ;;  %vm1549_vm0 = vcmp.lt.f32.partialorder %v327_v54, 0.0004427343 }
  0x9a   :  { %v314_v63 = vmul.f32 0.6931472, %v992_v56  ;;  %v994_v35 = vpop.eup %993  ;;  %v900_v13 = vpack.c.bf16 %v389_v57, %v388_v26  ;;  %v375_v14 = vmul.f32 %v359_v52, %v343_v62  ;;  %vm137_vm1 = vcmp.gt.f32.partialorder %v1441_v8, 20.0 }
  0x9b   :  { %v996_v39 = vpop.eup %995  ;;  %v390_v2 = vadd.f32 %v374_v53, %v102_v58  ;;  %v323_v31 = vmul.f32 0.6931472, %v994_v35  ;;  %vm734_vm3 = vcmp.gt.f32.partialorder %v1465_v11, 20.0  ;;  %vm771_vm4 = vcmask 1040384  }
  0x9c   :  { %v320_v61 = vsel %vm1541_vm15, %v317_v38, %v314_v63  ;;  %901 = vmatpush3.bf16.msra.mxu0 %v900_v13  ;;  %v391_v60 = vadd.f32 %v375_v14, %v103_v59  ;;  %v738_v10 = vadd.f32 1.0, %v996_v39  ;;  %v741_v17 = vmul.f32 -0.5, %v996_v39 }
  0x9d   :  { %v344_v55 = vsel %vm136_vm14, %v1432_v22, %v320_v61  ;;  %902 = vmatprep.subr.bf16.mxu0 %v1137_v0  ;;  %v329_v5 = vsel %vm1549_vm0, %v326_v7, %v323_v31  ;;  %v744_v32 = vand.u32 2147483647, %v996_v39  ;;  %v754_v53 = vshrl.u32 %v648_v36, 7 }
  0x9e   :  { %v376_v1 = vmul.f32 %v360_v19, %v344_v55  ;;  %v903_v15 = vpack.c.bf16 %v391_v60, %v390_v2  ;;  %v345_v24 = vsel %vm137_vm1, %v1441_v8, %v329_v5  ;;  %997 = vlog2.f32 %v738_v10 }
  0x9f   :  { %v377_v18 = vmul.f32 %v361_v3, %v345_v24  ;;  %v742_v29 = vadd.f32 1.0, %v741_v17  ;;  %vm745_vm2 = vcmp.lt.f32.partialorder %v744_v32, 0.0004427343  ;;  %v755_v7 = vsub.s32 0, %v754_v53 }
  0xa0   :  { %v392_v21 = vadd.f32 %v376_v1, %v104_v12  ;;  %904 = vmatpush3.bf16.msra.mxu0 %v903_v15 }
  0xa1   :  { %905 = vmatprep.subr.bf16.mxu0 %v1137_v0  ;;  %v393_v22 = vadd.f32 %v377_v18, %v105_v20  ;;  %v743_v34 = vmul.f32 %v996_v39, %v742_v29  ;;  %v732_v0 = vld [vmem:[%s1602_s3] sm:$0x1] }
  0xa2   :  { %v764_v30 = vmul.f32 %v732_v0, %v732_v0 }
  0xa3   :  { %v906_v16 = vpack.c.bf16 %v393_v22, %v392_v21 }
  0xa5   :  { %907 = vmatpush3.bf16.msra.mxu0 %v906_v16 }
  0xa8   :  { %v998_v43 = vpop.eup %997  ;;  %882 = vmatmul.mubr.f32.vlgmr.msra.gmra.mrb[0].mxu0 %v395_v33 }
  0xa9   :  { %v740_v8 = vmul.f32 0.6931472, %v998_v43 }
  0xab   :  { %v746_v6 = vsel %vm745_vm2, %v743_v34, %v740_v8 }
  0xac   :  { %v747_v9 = vsel %vm734_vm3, %v1465_v11, %v746_v6 }
  0xad   :  { %999 = vlog2.f32 %v747_v9  ;;  %v763_v40 = vmul.f32 %v747_v9, %v747_v9  ;;  %v749_v62 = vmul.f32 %v748_v48, %v747_v9 }
  0xaf   :  { %v765_v27 = vadd.f32 %v764_v30, %v763_v40  ;;  %v750_v63 = vadd.f32 %v749_v62, %v732_v0 }
  0xb1   :  { %v766_v37 = vmul.f32 0.5, %v765_v27  ;;  %v756_v35 = vrot.slane %v750_v63, %v755_v7 }
  0xb7   :  { %v1000_v41 = vpop.eup %999 }
  0xb8   :  { %v761_v51 = vmul.f32 0.6931472, %v1000_v41 }
  0xba   :  { %v762_v44 = vsub.f32 0.0, %v761_v51 }
  0xbc   :  { %v767_v42 = vadd.f32 %v766_v37, %v762_v44 }
  0xbe   :  { %v831_v45 = vadd.f32 -0.5, %v767_v42 }
  0xc0   :  { %v769_v28 = vsel %vm668_vm5, %v831_v45, 0.0 }
  0xc1   :  { %v772_v26 = vsel %vm771_vm4, %v769_v28, 0.0 }
  0xc2   :  { %773 = vadd.xlane.f32.xlu0 %v772_v26 }
 0x122   :  { %v718_v11 = vpop.xlane.xlu0 %717 }
 0x123   :  { %v719_v46 = vrot.slane %v718_v11, 4 }
 0x125   :  { %v720_v47 = vadd.f32 %v719_v46, %v718_v11 }
 0x127   :  { %v721_v54 = vrot.slane %v720_v47, 2 }
 0x129   :  { %v722_v50 = vadd.f32 %v721_v54, %v720_v47 }
 0x12b   :  { %v723_v52 = vrot.slane %v722_v50, 1 }
 0x12d   :  { %v724_v38 = vadd.f32 %v723_v52, %v722_v50 }
 0x12f   :  { %908 = vpush %v724_v38 }
 0x14f   :  { %v774_v56 = vpop.xlane.xlu0 %773 }
 0x150   :  { %v775_v57 = vrot.slane %v774_v56, 4 }
 0x152   :  { %v776_v58 = vadd.f32 %v775_v57, %v774_v56 }
 0x154   :  { %v777_v25 = vrot.slane %v776_v58, 2 }
 0x156   :  { %v778_v23 = vadd.f32 %v777_v25, %v776_v58 }
 0x158   :  { %v779_v49 = vrot.slane %v778_v23, 1 }
 0x15a   :  { %v780_v59 = vadd.f32 %v779_v49, %v778_v23 }
 0x15c   :  { %910 = vpush %v780_v59 }
 0x17b   :  { %v462_v13 = vpop.f32.mrb[0].mxu0 }
 0x17c   :  { %v758_v14 = vadd.f32 %v756_v35, %v462_v13  ;;  %v883_v4 = vpop.f32.mrb[1].mxu0 }
 0x17e   :  { %759 = vst [vmem:[#allocation13] sm:$0xff] %v758_v14 }
 0x17f   :  { %1100 = shalt.err (!%p1097_p8)
}
 0x180   :  { %s1101_s14 = scalar_lea.hbm %s1606_s7, 128 }
 0x181   :  { %p1102_p9 = scmp.ne.s32.totalorder %s1606_s7, %s1101_s14  ;;  %p1105_p10 = scmp.lt.u32.totalorder %s1101_s14, %s1606_s7 }
 0x183   :  { %p1107_p11 = pnand %p1105_p10, %p1102_p9 }
 0x185   :  { %1110 = shalt.err (!%p1107_p11)
}
 0x186   :  { %794 = dma.vmem_to_hbm [thread:$0]  %s792_s11, 128, %s1606_s7, [#allocation6]  }
 0x187   :  { %s909_s23 = spop %908  ;;  %s1111_s29 = scalar_lea.hbm %s1607_s8, 16 }
 0x188   :  { %p1112_p12 = scmp.ne.s32.totalorder %s1607_s8, %s1111_s29  ;;  %p1115_p13 = scmp.lt.u32.totalorder %s1111_s29, %s1607_s8 }
 0x18a   :  { %p1117_p0 = pnand %p1115_p13, %p1112_p12 }
 0x18d   :  { %s911_s24 = spop %910 }
 0x18e   :  { %s782_s25 = sadd.f32 %s911_s24, %s909_s23 }
 0x190   :  { %784 = sst [smem:[#allocation14]] %s782_s25 }
 0x191   :  { %1120 = shalt.err (!%p1117_p0)
}
 0x192   :  { %s1141_s22 = smov [#allocation14]  }
 0x193   :  { %802 = dma.smem_to_hbm %s1141_s22, 16, %s1607_s8, [#allocation7]  }
 0x194   :  { %1127 = dma.done.wait [#allocation6], 128  }
 0x195   :  { %1128 = vsyncadd [#allocation6], 4294967168 }
 0x196   :  { %1129 = dma.done.wait [#allocation7], 16  }
 0x197   :  { %1130 = vsyncadd [#allocation7], 4294967280 }
 0x198   :  { %809 = sfence }
 0x199   :  { %810 = vsyncpa [#allocation5], 1 }
 0x19a   :  { %811 = vsyncpa [#allocation9], 1 }
 0x19b   :  { %812 = vsyncpa [#allocation12], 1 }
 0x19c   :  { %813 = vsyncpa [#allocation6], 1 }
 0x19d   :  { %814 = vsyncpa [#allocation7], 1 }

</bundles_post_ra>
